<compile_context>
chip_gen: v7x
topology: tpu7x:2x2x1
jax: 0.10.0
libtpu: 0.0.40
codegen_flags: <defaults>
</compile_context>

<pallas_src>
import functools

import jax
import jax.numpy as jnp
from jax import lax
from jax.experimental import pallas as pl
from jax.experimental.pallas import tpu as pltpu


def _round_up(x, m):
    return ((x + m - 1) // m) * m


def _even_tile(size, cap, granule):
    """Largest tile <= cap (multiple of `granule`) that splits `size` with minimal pad."""
    size_r = _round_up(max(size, 1), granule)
    if size_r <= cap:
        return size_r
    nblk = -(-size_r // cap)
    return _round_up(-(-size_r // nblk), granule)


def _vmem_capacity_bytes():
    try:
        return int(pltpu.get_tpu_info().vmem_capacity_bytes)
    except Exception:
        return 64 << 20   # conservative fallback (v7x per-core VMEM)


# --------------------- Pass 1 kernel (BN on): matmul + partial stats ----------------
def _linear_stats_kernel(x_ref, w_ref, y_ref, sum_ref, sq_ref, *scratch):
    # grid = (j: feature tiles, i: row tiles, k: contraction tiles)
    def _finish(y):
        y_ref[...] = y.astype(y_ref.dtype)
        # Per-(row-tile, feature-tile) partials -> both i and j axes stay independent
        # ("parallel"); the tiny cross-row-tile reduction happens outside the kernel.
        sum_ref[...] = jnp.sum(y, axis=0, keepdims=True)[None]
        sq_ref[...] = jnp.sum(y * y, axis=0, keepdims=True)[None]

    if not scratch:          # full-K tile (kt == 1): no k loop, write through
        _finish(jnp.dot(x_ref[...], w_ref[...], preferred_element_type=jnp.float32))
    else:                    # k_in too large for one tile: f32 VMEM accumulator
        (acc_ref,) = scratch
        k = pl.program_id(2)

        @pl.when(k == 0)
        def _():
            acc_ref[...] = jnp.zeros_like(acc_ref)

        acc_ref[...] += jnp.dot(x_ref[...], w_ref[...],
                                preferred_element_type=jnp.float32)

        @pl.when(k == pl.num_programs(2) - 1)
        def _():
            _finish(acc_ref[...])


# ------------- Fused single-pass kernel (BN off): matmul + bias + ReLU (+res) -------
def _linear_act_kernel(*refs, residual):
    if residual:
        x_ref, w_ref, b_ref, r_ref, o_ref, *scratch = refs
    else:
        x_ref, w_ref, b_ref, o_ref, *scratch = refs
        r_ref = None

    def _finish(y):
        y = jnp.maximum(y + b_ref[...].astype(jnp.float32), 0.0)
        if residual:
            y = y + r_ref[...].astype(jnp.float32)
        o_ref[...] = y.astype(o_ref.dtype)

    if not scratch:
        _finish(jnp.dot(x_ref[...], w_ref[...], preferred_element_type=jnp.float32))
    else:
        (acc_ref,) = scratch
        k = pl.program_id(2)

        @pl.when(k == 0)
        def _():
            acc_ref[...] = jnp.zeros_like(acc_ref)

        acc_ref[...] += jnp.dot(x_ref[...], w_ref[...],
                                preferred_element_type=jnp.float32)

        @pl.when(k == pl.num_programs(2) - 1)
        def _():
            _finish(acc_ref[...])


# --------------------- Pass 2 kernel (BN on): normalize + ReLU (+res) ---------------
def _bn_relu_kernel(*refs, residual, eps, inv_n):
    if residual:
        y_ref, sum_ref, sq_ref, gamma_ref, beta_ref, r_ref, o_ref = refs
    else:
        y_ref, sum_ref, sq_ref, gamma_ref, beta_ref, o_ref = refs
        r_ref = None

    y = y_ref[...].astype(jnp.float32)
    mean = sum_ref[...] * inv_n
    var = jnp.maximum(sq_ref[...] * inv_n - mean * mean, 0.0)
    scale = lax.rsqrt(var + eps) * gamma_ref[...].astype(jnp.float32)   # EUP slot
    shift = beta_ref[...].astype(jnp.float32) - mean * scale
    y = jnp.maximum(y * scale + shift, 0.0)
    if residual:
        y = y + r_ref[...].astype(jnp.float32)
    o_ref[...] = y.astype(o_ref.dtype)


# -------------------------------------- Wrapper --------------------------------------
def fc_layer_forward(inputs, weight, bias, gamma, beta,
                     *, use_bn: bool = True, eps: float = 1e-5):
    """Pallas equivalent of FCLayer.forward.

    inputs: (..., k_in)
    weight: (k_out, k_in)   (PyTorch Linear layout; transposed+padded here once per call)
    bias, gamma, beta: (k_out,)
    """
    k_out, k_in = weight.shape
    residual = (k_out == k_in)
    lead_shape = inputs.shape[:-1]
    n = 1
    for s in lead_shape:
        n *= int(s)
    dtype = inputs.dtype
    x2d = inputs.reshape(n, k_in)

    in_eb = jnp.dtype(dtype).itemsize
    w_eb = jnp.dtype(weight.dtype).itemsize

    # ---- generation-aware VMEM budget and tile caps ---------------------------------
    vmem_cap = _vmem_capacity_bytes()
    big_vmem = vmem_cap >= (96 << 20)                 # v5e/v6e: 128 MiB physical
    vmem_limit = int(min(max(vmem_cap - (16 << 20), 32 << 20), 100 << 20))

    gen_mult = 2 if big_vmem else 1
    tk_cap = (2048 if max(in_eb, w_eb) <= 2 else 1024) * gen_mult   # full-K preferred
    tn_cap = 1024
    tm_cap = 512 * gen_mult

    tm = _even_tile(n, tm_cap, 8)
    if residual:
        # Residual needs identical feature padding/tiling for x and the output.
        t = _even_tile(max(k_in, k_out), min(tk_cap, tn_cap), 128)
        tk = tn = t
        kin_pad = kout_pad = _round_up(max(k_in, k_out), t)
        assert kin_pad == kout_pad and tk == tn
    else:
        tk = _even_tile(k_in, tk_cap, 128)
        tn = _even_tile(k_out, tn_cap, 128)
        kin_pad = _round_up(k_in, tk)
        kout_pad = _round_up(k_out, tn)
    n_pad = _round_up(n, tm)

    nt, jt, kt = n_pad // tm, kout_pad // tn, kin_pad // tk

    # TODO(synk): in a real model keep the padded/transposed parameters cached at init
    # so these per-call pads/transposes are one-time HBM copies, not per-forward.
    xp = jnp.pad(x2d, ((0, n_pad - n), (0, kin_pad - k_in)))
    # Weight stored as (k_in_pad, k_out_pad): plain (tm,tk)x(tk,tn) MXU contraction,
    # no per-tile transpose inside the kernel.
    wp = jnp.pad(weight.T, ((0, kin_pad - k_in), (0, kout_pad - k_out)))

    mm_in_specs = [
        pl.BlockSpec((tm, tk), lambda j, i, k: (i, k)),    # x tile
        pl.BlockSpec((tk, tn), lambda j, i, k: (k, j)),    # W^T tile (resident across i)
    ]
    scratch = [pltpu.VMEM((tm, tn), jnp.float32)] if kt > 1 else []
    mm_params = pltpu.CompilerParams(
        dimension_semantics=("parallel", "parallel", "arbitrary"),
        vmem_limit_bytes=vmem_limit)

    if not use_bn:
        # ---- fused single pass: matmul + bias + ReLU (+ residual); no intermediate --
        bp = jnp.pad(bias, (0, kout_pad - k_out)).reshape(1, kout_pad).astype(jnp.float32)
        in_specs = mm_in_specs + [pl.BlockSpec((1, tn), lambda j, i, k: (0, j))]
        args = [xp, wp, bp]
        if residual:
            in_specs.append(pl.BlockSpec((tm, tn), lambda j, i, k: (i, j)))
            args.append(xp)
        out2d = pl.pallas_call(
            functools.partial(_linear_act_kernel, residual=residual),
            out_shape=jax.ShapeDtypeStruct((n_pad, kout_pad), dtype),
            grid=(jt, nt, kt),
            in_specs=in_specs,
            out_specs=pl.BlockSpec((tm, tn), lambda j, i, k: (i, j)),
            scratch_shapes=scratch,
            compiler_params=mm_params,
        )(*args)
        return out2d[:n, :k_out].reshape(*lead_shape, k_out)

    # ---- Pass 1 (BN on): matmul + per-(row-tile, feature) partial batch stats -------
    # Bias is skipped (it cancels in the BN mean subtraction).  Padded rows/cols are
    # exactly zero and contribute nothing to the stats; the true n is used below.
    # TODO(synk): add a single-pass VMEM-resident column-stripe variant (keep the whole
    # (n_pad x tn) stripe in scratch) for small/moderate n_pad to drop this intermediate.
    y_mid, sum_part, sq_part = pl.pallas_call(
        _linear_stats_kernel,
        out_shape=(
            jax.ShapeDtypeStruct((n_pad, kout_pad), dtype),        # y in input dtype
            jax.ShapeDtypeStruct((nt, 1, kout_pad), jnp.float32),  # per-row-tile sums
            jax.ShapeDtypeStruct((nt, 1, kout_pad), jnp.float32),  # per-row-tile sumsq
        ),
        grid=(jt, nt, kt),
        in_specs=mm_in_specs,
        out_specs=(
            pl.BlockSpec((tm, tn), lambda j, i, k: (i, j)),
            pl.BlockSpec((1, 1, tn), lambda j, i, k: (i, 0, j)),
            pl.BlockSpec((1, 1, tn), lambda j, i, k: (i, 0, j)),
        ),
        scratch_shapes=scratch,
        compiler_params=mm_params,
    )(xp, wp)

    # Tiny (nt, k_out) reductions of the partials -> batch mean/var inputs (f32).
    ysum = jnp.sum(sum_part, axis=0)   # (1, kout_pad)
    ysq = jnp.sum(sq_part, axis=0)     # (1, kout_pad)

    gp = jnp.pad(gamma, (0, kout_pad - k_out)).reshape(1, kout_pad).astype(jnp.float32)
    btp = jnp.pad(beta, (0, kout_pad - k_out)).reshape(1, kout_pad).astype(jnp.float32)

    in_specs = [
        pl.BlockSpec((tm, tn), lambda i, j: (i, j)),   # y tile
        pl.BlockSpec((1, tn), lambda i, j: (0, j)),    # sum
        pl.BlockSpec((1, tn), lambda i, j: (0, j)),    # sum of squares
        pl.BlockSpec((1, tn), lambda i, j: (0, j)),    # gamma
        pl.BlockSpec((1, tn), lambda i, j: (0, j)),    # beta
    ]
    args = [y_mid, ysum, ysq, gp, btp]
    if residual:
        assert kin_pad == kout_pad and tk == tn
        in_specs.append(pl.BlockSpec((tm, tn), lambda i, j: (i, j)))
        args.append(xp)

    out2d = pl.pallas_call(
        functools.partial(_bn_relu_kernel, residual=residual,
                          eps=float(eps), inv_n=1.0 / n),
        out_shape=jax.ShapeDtypeStruct((n_pad, kout_pad), dtype),
        grid=(nt, jt),
        in_specs=in_specs,
        out_specs=pl.BlockSpec((tm, tn), lambda i, j: (i, j)),
        compiler_params=pltpu.CompilerParams(
            dimension_semantics=("parallel", "parallel"),
            vmem_limit_bytes=vmem_limit),
    )(*args)

    return out2d[:n, :k_out].reshape(*lead_shape, k_out)


def _reference_forward(inputs, weight, bias, gamma, beta,
                       *, use_bn: bool = True, eps: float = 1e-5):
    """Pure-JAX reference mirroring the PyTorch module (training-mode BN)."""
    k_out, k_in = weight.shape
    residual = (k_out == k_in)
    lead_shape = inputs.shape[:-1]
    x = inputs.reshape(-1, k_in)
    y = x @ weight.T + bias
    if use_bn:
        mean = jnp.mean(y, axis=0, keepdims=True)
        var = jnp.mean((y - mean) ** 2, axis=0, keepdims=True)
        y = (y - mean) / jnp.sqrt(var + eps) * gamma + beta
    y = jax.nn.relu(y)
    y = y.reshape(*lead_shape, k_out)
    if residual:
        y = y + inputs
    return y


if __name__ == "__main__":
    key = jax.random.PRNGKey(0)
    k_x, k_w, k_b, k_x3 = jax.random.split(key, 4)

    batch, seq, k_in = 2, 8, 32
    x = jax.random.normal(k_x, (batch, seq, k_in), dtype=jnp.float32)
    bound = k_in ** -0.5

    # --- case 1: k_out == k_in -> residual path, BN on (FCLayer(k_in)) --------------
    k_out = 32
    weight = jax.random.uniform(k_w, (k_out, k_in), jnp.float32, -bound, bound)
    bias = jax.random.uniform(k_b, (k_out,), jnp.float32, -bound, bound)
    gamma = jnp.ones((k_out,), jnp.float32)   # BatchNorm1d default init
    beta = jnp.zeros((k_out,), jnp.float32)

    out = jax.block_until_ready(
        fc_layer_forward(x, weight, bias, gamma, beta, use_bn=True))
    ref = _reference_forward(x, weight, bias, gamma, beta, use_bn=True)
    assert out.shape == (batch, seq, k_out), out.shape
    assert jnp.allclose(out, ref, atol=5e-4, rtol=5e-4), \
        float(jnp.max(jnp.abs(out - ref)))

    # --- case 2: k_out != k_in, BN off -> fused single-pass bias+ReLU path ----------
    k_out2 = 48
    w2 = jax.random.uniform(k_w, (k_out2, k_in), jnp.float32, -bound, bound)
    b2 = jax.random.uniform(k_b, (k_out2,), jnp.float32, -bound, bound)
    g2 = jnp.ones((k_out2,), jnp.float32)
    bt2 = jnp.zeros((k_out2,), jnp.float32)

    out2 = jax.block_until_ready(
        fc_layer_forward(x, w2, b2, g2, bt2, use_bn=False))
    ref2 = _reference_forward(x, w2, b2, g2, bt2, use_bn=False)
    assert out2.shape == (batch, seq, k_out2), out2.shape
    assert jnp.allclose(out2, ref2, atol=5e-4, rtol=5e-4), \
        float(jnp.max(jnp.abs(out2 - ref2)))

    # --- case 3: k_out != k_in, BN on, row count not a multiple of 8 (padding) ------
    x3 = jax.random.normal(k_x3, (2, 7, k_in), dtype=jnp.float32)
    out3 = jax.block_until_ready(
        fc_layer_forward(x3, w2, b2, g2, bt2, use_bn=True))
    ref3 = _reference_forward(x3, w2, b2, g2, bt2, use_bn=True)
    assert out3.shape == (2, 7, k_out2), out3.shape
    assert jnp.allclose(out3, ref3, atol=5e-4, rtol=5e-4), \
        float(jnp.max(jnp.abs(out3 - ref3)))

    print("KERNEL_OK")
</pallas_src>

<mosaic_0001>
module attributes {stable_mosaic.version = 11 : i64} {
  func.func @_linear_stats_kernel(%arg0: i32, %arg1: i32, %arg2: i32, %arg3: memref<16x128xf32, #tpu.memory_space<vmem>>, %arg4: memref<128x128xf32, #tpu.memory_space<vmem>>, %arg5: memref<16x128xf32, #tpu.memory_space<vmem>>, %arg6: memref<1x1x128xf32, #tpu.memory_space<vmem>>, %arg7: memref<1x1x128xf32, #tpu.memory_space<vmem>>) attributes {dimension_semantics = [#tpu.dimension_semantics<parallel>, #tpu.dimension_semantics<parallel>, #tpu.dimension_semantics<arbitrary>], iteration_bounds = array<i64: 1, 1, 1>, scalar_prefetch = 0 : i64, scratch_operands = 0 : i64, tpu.core_type = #tpu.core_type<tc>, window_params = [{transform_indices = @transform_0, window_bounds = array<i64: 16, 128>}, {transform_indices = @transform_1, window_bounds = array<i64: 128, 128>}, {transform_indices = @transform_2, window_bounds = array<i64: 16, 128>}, {transform_indices = @transform_3, window_bounds = array<i64: 1, 1, 128>}, {transform_indices = @transform_4, window_bounds = array<i64: 1, 1, 128>}]} {
    %c0 = arith.constant 0 : index
    %c0_0 = arith.constant 0 : index
    %0 = vector.load %arg3[%c0, %c0_0] : memref<16x128xf32, #tpu.memory_space<vmem>>, vector<16x128xf32>
    %c0_1 = arith.constant 0 : index
    %c0_2 = arith.constant 0 : index
    %1 = vector.load %arg4[%c0_1, %c0_2] : memref<128x128xf32, #tpu.memory_space<vmem>>, vector<128x128xf32>
    %cst = arith.constant dense<0.000000e+00> : vector<16x128xf32>
    %2 = tpu.matmul %0, %1, %cst {dimension_numbers = #tpu.dot_dimension_numbers<[1], [0], [0], [1], [0, 0, 1, 1], [], []>} : vector<16x128xf32>, vector<128x128xf32>, vector<16x128xf32> -> vector<16x128xf32>
    %c0_3 = arith.constant 0 : index
    %c0_4 = arith.constant 0 : index
    %3 = vector.load %arg5[%c0_3, %c0_4] : memref<16x128xf32, #tpu.memory_space<vmem>>, vector<16x128xf32>
    tpu.vector_store %arg5[%c0_3, %c0_4], %2 {strides = array<i32>} : memref<16x128xf32, #tpu.memory_space<vmem>>, vector<16x128xf32>,
    %cst_5 = arith.constant dense<0.000000e+00> : vector<128xf32>
    %4 = vector.multi_reduction <add>, %2, %cst_5 [0] : vector<16x128xf32> to vector<128xf32>
    %5 = vector.shape_cast %4 : vector<128xf32> to vector<1x128xf32>
    %6 = vector.shape_cast %5 : vector<1x128xf32> to vector<1x1x128xf32>
    %c0_6 = arith.constant 0 : index
    %c0_7 = arith.constant 0 : index
    %c0_8 = arith.constant 0 : index
    %7 = vector.load %arg6[%c0_6, %c0_7, %c0_8] : memref<1x1x128xf32, #tpu.memory_space<vmem>>, vector<1x1x128xf32>
    tpu.vector_store %arg6[%c0_6, %c0_7, %c0_8], %6 {strides = array<i32>} : memref<1x1x128xf32, #tpu.memory_space<vmem>>, vector<1x1x128xf32>,
    %8 = arith.mulf %2, %2 : vector<16x128xf32>
    %cst_9 = arith.constant dense<0.000000e+00> : vector<128xf32>
    %9 = vector.multi_reduction <add>, %8, %cst_9 [0] : vector<16x128xf32> to vector<128xf32>
    %10 = vector.shape_cast %9 : vector<128xf32> to vector<1x128xf32>
    %11 = vector.shape_cast %10 : vector<1x128xf32> to vector<1x1x128xf32>
    %c0_10 = arith.constant 0 : index
    %c0_11 = arith.constant 0 : index
    %c0_12 = arith.constant 0 : index
    %12 = vector.load %arg7[%c0_10, %c0_11, %c0_12] : memref<1x1x128xf32, #tpu.memory_space<vmem>>, vector<1x1x128xf32>
    tpu.vector_store %arg7[%c0_10, %c0_11, %c0_12], %11 {strides = array<i32>} : memref<1x1x128xf32, #tpu.memory_space<vmem>>, vector<1x1x128xf32>,
    return
  }
  func.func @transform_0(%arg0: i32, %arg1: i32, %arg2: i32) -> (i32, i32) {
    %c0_i32 = arith.constant 0 : i32
    return %arg1, %arg2 : i32, i32
  }
  func.func @transform_1(%arg0: i32, %arg1: i32, %arg2: i32) -> (i32, i32) {
    %c0_i32 = arith.constant 0 : i32
    return %arg2, %arg0 : i32, i32
  }
  func.func @transform_2(%arg0: i32, %arg1: i32, %arg2: i32) -> (i32, i32) {
    %c0_i32 = arith.constant 0 : i32
    return %arg1, %arg0 : i32, i32
  }
  func.func @transform_3(%arg0: i32, %arg1: i32, %arg2: i32) -> (i32, i32, i32) {
    %c0_i32 = arith.constant 0 : i32
    %c0_i32_0 = arith.constant 0 : i32
    return %arg1, %c0_i32, %arg0 : i32, i32, i32
  }
  func.func @transform_4(%arg0: i32, %arg1: i32, %arg2: i32) -> (i32, i32, i32) {
    %c0_i32 = arith.constant 0 : i32
    %c0_i32_0 = arith.constant 0 : i32
    return %arg1, %c0_i32, %arg0 : i32, i32, i32
  }
}

</mosaic_0001>

<bundles_post_ra>
// kernel: tpu_custom_call.1
= control target key start
LH: loop header
LB: loop body
LE: loop exit
PB: predicated region body
PF: predicated region fallthrough
CT: control target
= control target key end

     0   :  { %10 = vsyncpa [#allocation3], 0  ;;  %s521_s0 = inlined_call_operand.hbm [shape: f32[16,128], index: 0, kind: input, shape index: {}]   ;;  %s522_s1 = inlined_call_operand.hbm [shape: f32[128,128], index: 1, kind: input, shape index: {}]   ;;  %s523_s2 = inlined_call_operand.hbm [shape: f32[16,128], index: 2, kind: output, shape index: {0}]   ;;  %s524_s3 = inlined_call_operand.hbm [shape: f32[1,1,128], index: 3, kind: output, shape index: {1}]   ;;  %s525_s4 = inlined_call_operand.hbm [shape: f32[1,1,128], index: 4, kind: output, shape index: {2}]  }
   0x1   :  { %11 = vsyncpa [#allocation6], 0 }
   0x2   :  { %12 = vsyncpa [#allocation4], 0 }
   0x3   :  { %13 = vsyncpa [#allocation9], 0  ;;  %s412_s15 = smov [#allocation2]   ;;  %s294_s19 = scalar_lea.hbm %s521_s0, 256 }
   0x4   :  { %s19_s16 = sshll.u32 %s412_s15, 4  ;;  %p295_p0 = scmp.ne.s32.totalorder %s521_s0, %s294_s19  ;;  %s20_s16 = int_to_ptr.vmem [resolvable:$true] %s19_s16 }
   0x5   :  { %p298_p1 = scmp.lt.u32.totalorder %s294_s19, %s521_s0 }
   0x7   :  { %p300_p2 = pnand %p298_p1, %p295_p0 }
   0x9   :  { %303 = shalt.err (!%p300_p2)
}
   0xa   :  { %s304_s24 = scalar_lea.vmem %s20_s16, 256  ;;  %p309_p4 = scmp.lt.s32.totalorder %s20_s16, %s20_s16 }
   0xb   :  { %p305_p3 = scmp.ne.s32.totalorder %s20_s16, %s304_s24  ;;  %p310_p5 = scmp.lt.s32.totalorder %s304_s24, %s304_s24 }
   0xd   :  { %p311_p6 = por %p310_p5, %p309_p4 }
   0xf   :  { %p312_p7 = pnand %p311_p6, %p305_p3 }
  0x11   :  { %315 = shalt.err (!%p312_p7)
}
  0x12   :  { %s413_s25 = smov 128   ;;  %s414_s26 = smov 8  }
  0x13   :  { %25 = dma.hbm_to_vmem [thread:$0]  %s521_s0, 256, %s20_s16, [#allocation3], %s413_s25, %s413_s25, %s414_s26  }
  0x14   :  { %s415_s29 = smov [#allocation5]   ;;  %s316_s7 = scalar_lea.hbm %s522_s1, 2048 }
  0x15   :  { %s31_s30 = sshll.u32 %s415_s29, 4  ;;  %p317_p8 = scmp.ne.s32.totalorder %s522_s1, %s316_s7  ;;  %s32_s30 = int_to_ptr.vmem [resolvable:$true] %s31_s30 }
  0x16   :  { %p320_p9 = scmp.lt.u32.totalorder %s316_s7, %s522_s1 }
  0x18   :  { %p322_p10 = pnand %p320_p9, %p317_p8 }
  0x1a   :  { %325 = shalt.err (!%p322_p10)
}
  0x1b   :  { %s326_s12 = scalar_lea.vmem %s32_s30, 2048  ;;  %p331_p12 = scmp.lt.s32.totalorder %s32_s30, %s32_s30 }
  0x1c   :  { %p327_p11 = scmp.ne.s32.totalorder %s32_s30, %s326_s12  ;;  %p332_p13 = scmp.lt.s32.totalorder %s326_s12, %s326_s12 }
  0x1e   :  { %p333_p0 = por %p332_p13, %p331_p12 }
  0x20   :  { %p334_p1 = pnand %p333_p0, %p327_p11 }
  0x22   :  { %337 = shalt.err (!%p334_p1)
}
  0x23   :  { %37 = dma.hbm_to_vmem [thread:$0]  %s522_s1, 2048, %s32_s30, [#allocation6], %s413_s25, %s413_s25, %s414_s26  }
  0x24   :  { %404 = dma.done.wait [#allocation3], 256  }
  0x25   :  { %405 = vsyncadd [#allocation3], 4294967040 }
  0x26   :  { %406 = dma.done.wait [#allocation6], 2048  }
  0x27   :  { %407 = vsyncadd [#allocation6], 4294965248  ;;  %v46_v0 = vld [vmem:[#allocation5] sm:$0xff]  ;;  %v47_v1 = vld [vmem:[#allocation5 + $0x8] sm:$0xff]  ;;  %s416_s1 = smov [#allocation7]  }
  0x28   :  { %v48_v2 = vld [vmem:[#allocation5 + $0x10] sm:$0xff]  ;;  %v255_v3 = vpack.c.bf16 %v47_v1, %v46_v0  ;;  %v49_v4 = vld [vmem:[#allocation5 + $0x18] sm:$0xff]  ;;  %v50_v6 = vld [vmem:[#allocation5 + $0x20] sm:$0xff]  ;;  %s162_s14 = sshll.u32 %s416_s1, 4  ;;  %s163_s14 = int_to_ptr.vmem [resolvable:$true] %s162_s14 }
  0x29   :  { %v259_v5 = vpack.c.bf16 %v49_v4, %v48_v2  ;;  %v51_v7 = vld [vmem:[#allocation5 + $0x28] sm:$0xff]  ;;  %v44_v9 = vld [vmem:[#allocation2] sm:$0xff]  ;;  %v53_v11 = vld [vmem:[#allocation5 + $0x38] sm:$0xff]  ;;  %s338_s15 = scalar_lea.vmem %s163_s14, 256  ;;  %p343_p3 = scmp.lt.s32.totalorder %s163_s14, %s163_s14 }
  0x2a   :  { %256 = vmatprep.subr.bf16.mxu0 %v255_v3  ;;  %v263_v8 = vpack.c.bf16 %v51_v7, %v50_v6  ;;  %v52_v10 = vld [vmem:[#allocation5 + $0x30] sm:$0xff]  ;;  %252 = vmatprep.mubr.f32.mxu0 %v44_v9  ;;  %v54_v13 = vld [vmem:[#allocation5 + $0x40] sm:$0xff]  ;;  %v55_v14 = vld [vmem:[#allocation5 + $0x48] sm:$0xff]  ;;  %p339_p2 = scmp.ne.s32.totalorder %s163_s14, %s338_s15  ;;  %p344_p4 = scmp.lt.s32.totalorder %s338_s15, %s338_s15 }
  0x2b   :  { %258 = vmatpush3.bf16.msra.mxu0 %v255_v3  ;;  %v267_v12 = vpack.c.bf16 %v53_v11, %v52_v10  ;;  %v271_v15 = vpack.c.bf16 %v55_v14, %v54_v13  ;;  %v56_v16 = vld [vmem:[#allocation5 + $0x50] sm:$0xff]  ;;  %v57_v17 = vld [vmem:[#allocation5 + $0x58] sm:$0xff]  ;;  %v58_v19 = vld [vmem:[#allocation5 + $0x60] sm:$0xff] }
  0x2c   :  { %260 = vmatprep.subr.bf16.mxu0 %v259_v5  ;;  %v275_v18 = vpack.c.bf16 %v57_v17, %v56_v16  ;;  %v59_v20 = vld [vmem:[#allocation5 + $0x68] sm:$0xff]  ;;  %v60_v22 = vld [vmem:[#allocation5 + $0x70] sm:$0xff]  ;;  %v61_v23 = vld [vmem:[#allocation5 + $0x78] sm:$0xff]  ;;  %p345_p5 = por %p344_p4, %p343_p3 }
  0x2d   :  { %v279_v21 = vpack.c.bf16 %v59_v20, %v58_v19  ;;  %v283_v24 = vpack.c.bf16 %v61_v23, %v60_v22  ;;  %v45_v25 = vld [vmem:[#allocation2 + $0x8] sm:$0xff] }
  0x2e   :  { %p346_p6 = pnand %p345_p5, %p339_p2 }
  0x2f   :  { %262 = vmatpush3.bf16.msra.mxu0 %v259_v5 }
  0x30   :  { %264 = vmatprep.subr.bf16.mxu0 %v263_v8 }
  0x33   :  { %266 = vmatpush3.bf16.msra.mxu0 %v263_v8 }
  0x34   :  { %268 = vmatprep.subr.bf16.mxu0 %v267_v12 }
  0x37   :  { %270 = vmatpush3.bf16.msra.mxu0 %v267_v12 }
  0x38   :  { %272 = vmatprep.subr.bf16.mxu0 %v271_v15 }
  0x3b   :  { %274 = vmatpush3.bf16.msra.mxu0 %v271_v15 }
  0x3c   :  { %276 = vmatprep.subr.bf16.mxu0 %v275_v18 }
  0x3f   :  { %278 = vmatpush3.bf16.msra.mxu0 %v275_v18 }
  0x40   :  { %280 = vmatprep.subr.bf16.mxu0 %v279_v21 }
  0x43   :  { %282 = vmatpush3.bf16.msra.mxu0 %v279_v21 }
  0x44   :  { %284 = vmatprep.subr.bf16.mxu0 %v283_v24 }
  0x47   :  { %286 = vmatpush3.bf16.msra.mxu0 %v283_v24 }
  0x4a   :  { %253 = vmatmul.mubr.f32.vlgmr.msra.gmra.mrb[0].mxu0 %v45_v25 }
 0x11d   :  { %v254_v26 = vpop.f32.mrb[0].mxu0 }
 0x11e   :  { %v148_v27 = vmul.f32 %v254_v26, %v254_v26  ;;  %138 = vst [vmem:[#allocation7 + $0x8] sm:$0xff] %v254_v26  ;;  %v128_v28 = vpop.f32.mrb[1].mxu0 }
 0x11f   :  { %137 = vst [vmem:[#allocation7] sm:$0xff] %v128_v28  ;;  %v139_v29 = vadd.f32 %v254_v26, %v128_v28  ;;  %v147_v30 = vmul.f32 %v128_v28, %v128_v28 }
 0x120   :  { %349 = shalt.err (!%p346_p6)
}
 0x121   :  { %s350_s18 = scalar_lea.hbm %s523_s2, 256 }
 0x122   :  { %p351_p7 = scmp.ne.s32.totalorder %s523_s2, %s350_s18  ;;  %p354_p8 = scmp.lt.u32.totalorder %s350_s18, %s523_s2 }
 0x124   :  { %p356_p9 = pnand %p354_p8, %p351_p7 }
 0x126   :  { %359 = shalt.err (!%p356_p9)
}
 0x127   :  { %168 = dma.vmem_to_hbm [thread:$0]  %s163_s14, 256, %s523_s2, [#allocation4], %s413_s25, %s413_s25, %s414_s26   ;;  %v140_v31 = vrot.slane %v139_v29, 4  ;;  %v149_v32 = vadd.f32 %v148_v27, %v147_v30 }
 0x128   :  { %s417_s27 = smov [#allocation8]   ;;  %s418_s29 = smov [#allocation10]  }
 0x129   :  { %v141_v33 = vadd.f32 %v140_v31, %v139_v29  ;;  %v150_v34 = vrot.slane %v149_v32, 4  ;;  %s175_s28 = sshll.u32 %s417_s27, 4  ;;  %s185_s30 = sshll.u32 %s418_s29, 4  ;;  %s176_s28 = int_to_ptr.vmem [resolvable:$true] %s175_s28  ;;  %s489_s30 = int_to_ptr.vmem [resolvable:$true] %s185_s30 }
 0x12a   :  { %s360_s2 = scalar_lea.vmem %s176_s28, 16  ;;  %s364_s25 = scalar_lea.vmem %s176_s28, 32 }
 0x12b   :  { %v142_v35 = vrot.slane %v141_v33, 2  ;;  %v151_v36 = vadd.f32 %v150_v34, %v149_v32  ;;  %p361_p10 = scmp.ne.s32.totalorder %s176_s28, %s360_s2  ;;  %p365_p11 = scmp.lt.s32.totalorder %s176_s28, %s176_s28 }
 0x12c   :  { %p366_p12 = scmp.lt.s32.totalorder %s364_s25, %s360_s2 }
 0x12d   :  { %v152_v37 = vrot.slane %v151_v36, 2  ;;  %v143_v38 = vadd.f32 %v142_v35, %v141_v33 }
 0x12e   :  { %p367_p13 = por %p366_p12, %p365_p11 }
 0x12f   :  { %v144_v39 = vrot.slane %v143_v38, 1  ;;  %v153_v40 = vadd.f32 %v152_v37, %v151_v36 }
 0x130   :  { %p368_p0 = pnand %p367_p13, %p361_p10 }
 0x131   :  { %v145_v41 = vadd.f32 %v144_v39, %v143_v38  ;;  %v154_v42 = vrot.slane %v153_v40, 1 }
 0x133   :  { %146 = vst [vmem:[#allocation8] sm:$0x1] %v145_v41  ;;  %v155_v43 = vadd.f32 %v154_v42, %v153_v40 }
 0x134   :  { %371 = shalt.err (!%p368_p0)
}
 0x135   :  { %s372_s6 = scalar_lea.hbm %s524_s3, 16 }
 0x136   :  { %p373_p1 = scmp.ne.s32.totalorder %s524_s3, %s372_s6  ;;  %p376_p2 = scmp.lt.u32.totalorder %s372_s6, %s524_s3 }
 0x138   :  { %p378_p3 = pnand %p376_p2, %p373_p1 }
 0x13a   :  { %381 = shalt.err (!%p378_p3)
}
 0x13b   :  { %178 = dma.vmem_to_hbm [thread:$0]  %s176_s28, 16, %s524_s3, [#allocation9]   ;;  %156 = vst [vmem:[#allocation10] sm:$0x1] %v155_v43 }
 0x13c   :  { %s382_s0 = scalar_lea.vmem %s489_s30, 16  ;;  %s386_s13 = scalar_lea.vmem %s489_s30, 32 }
 0x13d   :  { %p383_p4 = scmp.ne.s32.totalorder %s489_s30, %s382_s0  ;;  %p387_p5 = scmp.lt.s32.totalorder %s489_s30, %s489_s30 }
 0x13e   :  { %p388_p6 = scmp.lt.s32.totalorder %s386_s13, %s382_s0 }
 0x140   :  { %p389_p7 = por %p388_p6, %p387_p5 }
 0x142   :  { %p390_p8 = pnand %p389_p7, %p383_p4 }
 0x144   :  { %393 = shalt.err (!%p390_p8)
}
 0x145   :  { %s394_s15 = scalar_lea.hbm %s525_s4, 16 }
 0x146   :  { %p395_p9 = scmp.ne.s32.totalorder %s525_s4, %s394_s15  ;;  %p398_p10 = scmp.lt.u32.totalorder %s394_s15, %s525_s4 }
 0x148   :  { %p400_p11 = pnand %p398_p10, %p395_p9 }
 0x14a   :  { %403 = shalt.err (!%p400_p11)
}
 0x14b   :  { %188 = dma.vmem_to_hbm [thread:$0]  %s489_s30, 16, %s525_s4, [#allocation9]  }
 0x14c   :  { %408 = dma.done.wait [#allocation4], 256  }
 0x14d   :  { %409 = vsyncadd [#allocation4], 4294967040 }
 0x14e   :  { %410 = dma.done.wait [#allocation9], 32  }
 0x14f   :  { %411 = vsyncadd [#allocation9], 4294967264 }
 0x150   :  { %198 = vsyncpa [#allocation3], 1 }
 0x151   :  { %199 = vsyncpa [#allocation6], 1 }
 0x152   :  { %200 = vsyncpa [#allocation4], 1 }
 0x153   :  { %201 = vsyncpa [#allocation9], 1 }

</bundles_post_ra>
